<compile_context>
chip_gen: v7x
topology: tpu7x:2x2x1
jax: 0.10.0
libtpu: 0.0.40
codegen_flags: <defaults>
</compile_context>

<pallas_src>
import functools

import jax
import jax.numpy as jnp
from jax.experimental import pallas as pl
from jax.experimental.pallas import tpu as pltpu


def _dice_loss_kernel(pred_ref, tgt_ref, out_ref, acc_ref, *,
                      label_weights, tot_weight, eps):
    """Grid = (B, n_h).

    pred block : (1, C, tile_h, W)  -> rows [h*tile_h, (h+1)*tile_h) of pred[b]
    tgt  block : (1, C, H, tile_h)  -> cols [h*tile_h, (h+1)*tile_h) of target[b]
                 (its in-kernel transpose is exactly the slab of
                  target[b].transpose(1, 2) that pairs with the pred block)
    acc_ref    : (2*C, 1, W) VMEM scratch with lane-resident per-class running
                 (intersection, union) partials for the current batch element.
    out_ref    : (1, 1, 1) per-batch weighted dice, written on the last
                 spatial step only.
    """
    h = pl.program_id(1)
    nh = pl.num_programs(1)

    @pl.when(h == 0)
    def _init():
        acc_ref[...] = jnp.zeros_like(acc_ref)

    for idx, (cls_idx, _) in enumerate(label_weights):  # static loop, C is tiny
        p_c = pred_ref[0, cls_idx].astype(jnp.float32)      # (tile_h, W)
        # Cast-then-transpose is the lowering-proven path on all generations.
        # TODO(synk): a native-dtype (bf16) transpose halves the XLU vreg
        # traffic and an MXU trace(P @ T) variant removes it entirely; the
        # XLU is idle here (DMA-bound kernel) so this is hygiene, not a
        # roofline mover.
        t_t = tgt_ref[0, cls_idx].astype(jnp.float32).T     # (tile_h, W) == target[b,c].T tile
        # Lane-resident partials: sublane-only reduce per step; the single
        # cross-lane reduce happens once, in the finalize below.
        inter_p = jnp.sum(p_c * t_t, axis=0, keepdims=True)           # (1, W)
        # union = sum(p) + sum(t) is transpose-invariant -> no (p + t) temp.
        union_p = (jnp.sum(p_c, axis=0, keepdims=True)
                   + jnp.sum(t_t, axis=0, keepdims=True))              # (1, W)
        acc_ref[2 * idx] = acc_ref[2 * idx] + inter_p
        acc_ref[2 * idx + 1] = acc_ref[2 * idx + 1] + union_p

    @pl.when(h == nh - 1)
    def _finalize():
        weighted = jnp.zeros((1, 1), jnp.float32)
        for idx, (_, w) in enumerate(label_weights):
            inter = jnp.sum(acc_ref[2 * idx], keepdims=True)       # (1, 1)
            union = jnp.sum(acc_ref[2 * idx + 1], keepdims=True)   # (1, 1)
            dice = (2.0 * inter + eps) / (union + eps)
            weighted = weighted + dice * (w / tot_weight)
        out_ref[0] = weighted                                      # per-batch weighted dice


def _vmem_budget_bytes():
    """Generation-aware VMEM budget: 3/4 of the physical per-core capacity
    (~96 MiB on v5e/v6e's 128 MiB, ~48 MiB on v7x's 64 MiB), leaving headroom
    for compiler-internal scratch."""
    try:
        info = pltpu.get_tpu_info()
        cap = int(getattr(info, "vmem_capacity_bytes", 0)) or 64 * 1024 * 1024
    except Exception:  # noqa: BLE001 - fall back to the smallest (v7x) size
        cap = 64 * 1024 * 1024
    return (cap * 3) // 4, cap


def _working_set_bytes(C, H, W, tile_h, p_isz, t_isz, n_labels, tgt_bufs=2):
    pred_blk = C * tile_h * W * p_isz            # contiguous row slab
    tgt_blk = C * H * tile_h * t_isz             # strided column slab
    io = 2 * pred_blk + tgt_bufs * tgt_blk       # pipeline-buffered inputs
    # In-kernel f32 temporaries (cast pred, cast target, transposed target,
    # product).  The static per-class Python loop does NOT bound live ranges,
    # so count every loss class.
    temps = n_labels * 4 * tile_h * W * 4
    acc = 2 * n_labels * max(W, 128) * 4         # lane-resident accumulator
    return io + temps + acc


def _pick_tile_h(C, H, W, p_isz, t_isz, n_labels, budget):
    """Largest tile_h whose pipelined working set (inputs + in-kernel
    temporaries) fits the generation-aware VMEM budget."""
    def ws(th):
        return _working_set_bytes(C, H, W, th, p_isz, t_isz, n_labels)

    if ws(H) <= budget:
        return H                                 # whole-plane blocks, grid=(B, 1)
    # When tiling, the target slab's last (lane) dim is tile_h -> it must be
    # a multiple of 128 that divides H so every element is covered once.
    cands = [th for th in range(128, H, 128) if H % th == 0]
    fitting = [th for th in cands if ws(th) <= budget]
    if fitting:
        return max(fitting)                      # biggest tile that fits
    if cands:
        return min(cands)                        # best effort; vmem limit raised in wrapper
    return H                                     # no valid divisor at all


def dice_loss(pred, target, *, mask_labels_numeric, mask_class_weights_dict,
              eps=1e-10):
    assert pred.shape == target.shape, "pred/target must match (B, C, H, W)"
    B, C, H, W = pred.shape
    # The reference multiplies pred by target.transpose(2, 3); the row/column
    # slab pairing used here requires square spatial planes.
    assert H == W, "DiceLoss reference needs H == W (target.transpose(2, 3))"

    labels = ["background", "organ"]
    if "tumour" in mask_labels_numeric:
        labels.append("tumour")
    label_weights = tuple(
        (int(mask_labels_numeric[k]), float(mask_class_weights_dict[k]))
        for k in labels
    )
    # tot_weight = sum of ALL dict values (matches torch.sum over dict values)
    tot_weight = float(sum(float(v) for v in mask_class_weights_dict.values()))
    n_labels = len(label_weights)

    p_isz = jnp.dtype(pred.dtype).itemsize
    t_isz = jnp.dtype(target.dtype).itemsize
    budget, vmem_cap = _vmem_budget_bytes()
    tile_h = _pick_tile_h(C, H, W, p_isz, t_isz, n_labels, budget)
    n_h = H // tile_h

    # Deeper pipelining on the strided target stream only, when tiling is in
    # play and there is VMEM headroom left (skip on a tight v7x budget).
    use_buf3 = (n_h > 1 and hasattr(pl, "Buffered")
                and _working_set_bytes(C, H, W, tile_h, p_isz, t_isz,
                                       n_labels, tgt_bufs=3) <= budget)
    ws = _working_set_bytes(C, H, W, tile_h, p_isz, t_isz, n_labels,
                            tgt_bufs=3 if use_buf3 else 2)
    # Explicit scoped-VMEM limit: at least the budget, and if the fallback
    # tile still overshoots, as much as the chip physically has.
    vmem_limit = int(min(vmem_cap, max(budget, ws + (4 << 20))))

    kernel = functools.partial(
        _dice_loss_kernel,
        label_weights=label_weights,
        tot_weight=tot_weight,
        eps=float(eps),
    )

    bytes_accessed = (int(pred.size) * p_isz + int(target.size) * t_isz + B * 4)
    cost = pl.CostEstimate(flops=4 * B * C * H * W, transcendentals=0,
                           bytes_accessed=int(bytes_accessed))

    tgt_shape = (1, C, H, tile_h)
    tgt_index = lambda b, h: (b, 0, 0, h)
    if use_buf3:
        tgt_spec = pl.BlockSpec(tgt_shape, tgt_index,
                                pipeline_mode=pl.Buffered(3))
    else:
        tgt_spec = pl.BlockSpec(tgt_shape, tgt_index)
    # TODO(synk): if tile_h ever has to stay small (huge H*W on v7x), fetch
    # the wider f32 pred as the strided column slab instead (transpose pred
    # in-kernel) so the strided DMA issues >= 512 B bursts; with the raised
    # VMEM budget tile_h is normally == H so this path is moot.

    out = pl.pallas_call(
        kernel,
        out_shape=jax.ShapeDtypeStruct((B, 1, 1), jnp.float32),
        grid_spec=pltpu.PrefetchScalarGridSpec(
            num_scalar_prefetch=0,
            grid=(B, n_h),
            in_specs=[
                # pred: contiguous row slab of the (H, W) plane
                pl.BlockSpec((1, C, tile_h, W), lambda b, h: (b, 0, h, 0)),
                # target: matching column slab (transposed inside the kernel)
                tgt_spec,
            ],
            out_specs=pl.BlockSpec((1, 1, 1), lambda b, h: (b, 0, 0)),
            scratch_shapes=[
                pltpu.VMEM((2 * n_labels, 1, W), jnp.float32),
            ],
        ),
        compiler_params=pltpu.CompilerParams(
            # batch axis independent (megacore); spatial axis is a reduction
            # carried in scratch -> "arbitrary"
            dimension_semantics=("parallel", "arbitrary"),
            vmem_limit_bytes=vmem_limit,
        ),
        cost_estimate=cost,
    )(pred, target)

    # TODO(synk): on v7x with B == 1 both TensorCores could be kept busy by a
    # size-2 parallel split of H emitting per-half partials combined here.
    # mean over the batch (dim=0) then negate (is_metric=False return path)
    return -jnp.mean(out[:, 0, 0])


def _dice_loss_reference(pred, target, *, mask_labels_numeric,
                         mask_class_weights_dict, eps=1e-10):
    """Pure-JAX transcription of the PyTorch forward (is_metric=False)."""
    pred = pred.astype(jnp.float32)
    target = jnp.swapaxes(target.astype(jnp.float32), 2, 3)
    inter = jnp.sum(pred * target, axis=(2, 3))
    union = jnp.sum(pred, axis=(2, 3)) + jnp.sum(target, axis=(2, 3))
    tot_weight = float(sum(float(v) for v in mask_class_weights_dict.values()))
    bg = (2 * inter[:, mask_labels_numeric["background"]] + eps) / (
        union[:, mask_labels_numeric["background"]] + eps)
    org = (2 * inter[:, mask_labels_numeric["organ"]] + eps) / (
        union[:, mask_labels_numeric["organ"]] + eps)
    acc = (bg * mask_class_weights_dict["background"]
           + org * mask_class_weights_dict["organ"])
    if "tumour" in mask_labels_numeric:
        tum = (2 * inter[:, mask_labels_numeric["tumour"]] + eps) / (
            union[:, mask_labels_numeric["tumour"]] + eps)
        acc = acc + tum * mask_class_weights_dict["tumour"]
    mean_dice = jnp.mean(acc / tot_weight, axis=0)
    return -mean_dice


if __name__ == "__main__":
    # Module config (classes=2, dimension=2, is_metric=False)
    mask_labels_numeric = {"background": 0, "organ": 1}
    mask_class_weights_dict = {"background": 1.0, "organ": 2.0}

    B, C, H, W = 2, 2, 16, 16
    key = jax.random.PRNGKey(0)
    k_pred, k_tgt = jax.random.split(key)

    # pred: per-pixel class probabilities (softmax over channel dim), f32.
    # (Optional v5e-only tradeoff: cast pred to bf16 here to cut the dominant
    # HBM stream by half -- skipped to keep exact parity with the PyTorch ref.)
    logits = jax.random.normal(k_pred, (B, C, H, W), dtype=jnp.float32)
    pred = jax.nn.softmax(logits, axis=1)

    # target: one-hot class masks in NCHW, kept in a narrow native dtype;
    # the kernel casts per tile (no wrapper-side up-cast / no wrapper transpose)
    labels = jax.random.randint(k_tgt, (B, H, W), 0, C)
    target = jnp.transpose(
        jax.nn.one_hot(labels, C, dtype=jnp.bfloat16), (0, 3, 1, 2))

    loss = dice_loss(
        pred, target,
        mask_labels_numeric=mask_labels_numeric,
        mask_class_weights_dict=mask_class_weights_dict,
    )
    loss = jax.block_until_ready(loss)

    ref = _dice_loss_reference(
        pred, target,
        mask_labels_numeric=mask_labels_numeric,
        mask_class_weights_dict=mask_class_weights_dict,
    )
    assert jnp.allclose(loss, ref, rtol=1e-5, atol=1e-6), (loss, ref)

    print("KERNEL_OK")
</pallas_src>

<mosaic_0001>
module attributes {stable_mosaic.version = 11 : i64} {
  func.func @_dice_loss_kernel(%arg0: i32, %arg1: i32, %arg2: memref<1x2x16x16xf32, #tpu.memory_space<vmem>>, %arg3: memref<1x2x16x16xbf16, #tpu.memory_space<vmem>>, %arg4: memref<1x1x1xf32, #tpu.memory_space<vmem>>, %arg5: memref<4x1x16xf32, #tpu.memory_space<vmem>>) attributes {dimension_semantics = [#tpu.dimension_semantics<parallel>, #tpu.dimension_semantics<arbitrary>], iteration_bounds = array<i64: 2, 1>, scalar_prefetch = 0 : i64, scratch_operands = 1 : i64, tpu.core_type = #tpu.core_type<tc>, window_params = [{transform_indices = @transform_0, window_bounds = array<i64: 1, 2, 16, 16>}, {transform_indices = @transform_1, window_bounds = array<i64: 1, 2, 16, 16>}, {transform_indices = @transform_2, window_bounds = array<i64: 1, 1, 1>}]} {
    %c0_i32 = arith.constant 0 : i32
    %0 = arith.cmpi eq, %arg1, %c0_i32 : i32
    %1 = arith.extui %0 : i1 to i32
    %c0_i32_0 = arith.constant 0 : i32
    %2 = arith.cmpi ne, %1, %c0_i32_0 : i32
    scf.if %2 {
      %cst_44 = arith.constant 0.000000e+00 : f32
      %58 = vector.broadcast %cst_44 : f32 to vector<4x1x16xf32>
      %c0_45 = arith.constant 0 : index
      %c0_46 = arith.constant 0 : index
      %c0_47 = arith.constant 0 : index
      %59 = vector.load %arg5[%c0_45, %c0_46, %c0_47] : memref<4x1x16xf32, #tpu.memory_space<vmem>>, vector<4x1x16xf32>
      tpu.vector_store %arg5[%c0_45, %c0_46, %c0_47], %58 {strides = array<i32>} : memref<4x1x16xf32, #tpu.memory_space<vmem>>, vector<4x1x16xf32>,
    } else {
    }
    %c0 = arith.constant 0 : index
    %c0_1 = arith.constant 0 : index
    %c0_2 = arith.constant 0 : index
    %c0_3 = arith.constant 0 : index
    %3 = vector.load %arg2[%c0, %c0_1, %c0_2, %c0_3] : memref<1x2x16x16xf32, #tpu.memory_space<vmem>>, vector<1x1x16x16xf32>
    %4 = vector.shape_cast %3 : vector<1x1x16x16xf32> to vector<16x16xf32>
    %c0_4 = arith.constant 0 : index
    %c0_5 = arith.constant 0 : index
    %c0_6 = arith.constant 0 : index
    %c0_7 = arith.constant 0 : index
    %5 = vector.load %arg3[%c0_4, %c0_5, %c0_6, %c0_7] : memref<1x2x16x16xbf16, #tpu.memory_space<vmem>>, vector<1x1x16x16xbf16>
    %6 = vector.shape_cast %5 : vector<1x1x16x16xbf16> to vector<16x16xbf16>
    %7 = arith.extf %6 : vector<16x16xbf16> to vector<16x16xf32>
    %8 = tpu.transpose %7, [1, 0] : vector<16x16xf32> -> vector<16x16xf32>
    %9 = arith.mulf %4, %8 : vector<16x16xf32>
    %cst = arith.constant dense<0.000000e+00> : vector<16xf32>
    %10 = vector.multi_reduction <add>, %9, %cst [0] : vector<16x16xf32> to vector<16xf32>
    %11 = vector.shape_cast %10 : vector<16xf32> to vector<1x16xf32>
    %cst_8 = arith.constant dense<0.000000e+00> : vector<16xf32>
    %12 = vector.multi_reduction <add>, %4, %cst_8 [0] : vector<16x16xf32> to vector<16xf32>
    %13 = vector.shape_cast %12 : vector<16xf32> to vector<1x16xf32>
    %cst_9 = arith.constant dense<0.000000e+00> : vector<16xf32>
    %14 = vector.multi_reduction <add>, %8, %cst_9 [0] : vector<16x16xf32> to vector<16xf32>
    %15 = vector.shape_cast %14 : vector<16xf32> to vector<1x16xf32>
    %16 = arith.addf %13, %15 : vector<1x16xf32>
    %c0_10 = arith.constant 0 : index
    %c0_11 = arith.constant 0 : index
    %c0_12 = arith.constant 0 : index
    %17 = vector.load %arg5[%c0_10, %c0_11, %c0_12] : memref<4x1x16xf32, #tpu.memory_space<vmem>>, vector<1x1x16xf32>
    %18 = vector.shape_cast %17 : vector<1x1x16xf32> to vector<1x16xf32>
    %19 = arith.addf %18, %11 : vector<1x16xf32>
    %c0_13 = arith.constant 0 : index
    %c0_14 = arith.constant 0 : index
    %c0_15 = arith.constant 0 : index
    %20 = vector.load %arg5[%c0_13, %c0_14, %c0_15] : memref<4x1x16xf32, #tpu.memory_space<vmem>>, vector<1x1x16xf32>
    %21 = vector.shape_cast %20 : vector<1x1x16xf32> to vector<1x16xf32>
    %22 = vector.shape_cast %19 : vector<1x16xf32> to vector<1x1x16xf32>
    tpu.vector_store %arg5[%c0_13, %c0_14, %c0_15], %22 {strides = array<i32>} : memref<4x1x16xf32, #tpu.memory_space<vmem>>, vector<1x1x16xf32>,
    %c1 = arith.constant 1 : index
    %c0_16 = arith.constant 0 : index
    %c0_17 = arith.constant 0 : index
    %23 = vector.load %arg5[%c1, %c0_16, %c0_17] : memref<4x1x16xf32, #tpu.memory_space<vmem>>, vector<1x1x16xf32>
    %24 = vector.shape_cast %23 : vector<1x1x16xf32> to vector<1x16xf32>
    %25 = arith.addf %24, %16 : vector<1x16xf32>
    %c1_18 = arith.constant 1 : index
    %c0_19 = arith.constant 0 : index
    %c0_20 = arith.constant 0 : index
    %26 = vector.load %arg5[%c1_18, %c0_19, %c0_20] : memref<4x1x16xf32, #tpu.memory_space<vmem>>, vector<1x1x16xf32>
    %27 = vector.shape_cast %26 : vector<1x1x16xf32> to vector<1x16xf32>
    %28 = vector.shape_cast %25 : vector<1x16xf32> to vector<1x1x16xf32>
    tpu.vector_store %arg5[%c1_18, %c0_19, %c0_20], %28 {strides = array<i32>} : memref<4x1x16xf32, #tpu.memory_space<vmem>>, vector<1x1x16xf32>,
    %c0_21 = arith.constant 0 : index
    %c1_22 = arith.constant 1 : index
    %c0_23 = arith.constant 0 : index
    %c0_24 = arith.constant 0 : index
    %29 = vector.load %arg2[%c0_21, %c1_22, %c0_23, %c0_24] : memref<1x2x16x16xf32, #tpu.memory_space<vmem>>, vector<1x1x16x16xf32>
    %30 = vector.shape_cast %29 : vector<1x1x16x16xf32> to vector<16x16xf32>
    %c0_25 = arith.constant 0 : index
    %c1_26 = arith.constant 1 : index
    %c0_27 = arith.constant 0 : index
    %c0_28 = arith.constant 0 : index
    %31 = vector.load %arg3[%c0_25, %c1_26, %c0_27, %c0_28] : memref<1x2x16x16xbf16, #tpu.memory_space<vmem>>, vector<1x1x16x16xbf16>
    %32 = vector.shape_cast %31 : vector<1x1x16x16xbf16> to vector<16x16xbf16>
    %33 = arith.extf %32 : vector<16x16xbf16> to vector<16x16xf32>
    %34 = tpu.transpose %33, [1, 0] : vector<16x16xf32> -> vector<16x16xf32>
    %35 = arith.mulf %30, %34 : vector<16x16xf32>
    %cst_29 = arith.constant dense<0.000000e+00> : vector<16xf32>
    %36 = vector.multi_reduction <add>, %35, %cst_29 [0] : vector<16x16xf32> to vector<16xf32>
    %37 = vector.shape_cast %36 : vector<16xf32> to vector<1x16xf32>
    %cst_30 = arith.constant dense<0.000000e+00> : vector<16xf32>
    %38 = vector.multi_reduction <add>, %30, %cst_30 [0] : vector<16x16xf32> to vector<16xf32>
    %39 = vector.shape_cast %38 : vector<16xf32> to vector<1x16xf32>
    %cst_31 = arith.constant dense<0.000000e+00> : vector<16xf32>
    %40 = vector.multi_reduction <add>, %34, %cst_31 [0] : vector<16x16xf32> to vector<16xf32>
    %41 = vector.shape_cast %40 : vector<16xf32> to vector<1x16xf32>
    %42 = arith.addf %39, %41 : vector<1x16xf32>
    %c2 = arith.constant 2 : index
    %c0_32 = arith.constant 0 : index
    %c0_33 = arith.constant 0 : index
    %43 = vector.load %arg5[%c2, %c0_32, %c0_33] : memref<4x1x16xf32, #tpu.memory_space<vmem>>, vector<1x1x16xf32>
    %44 = vector.shape_cast %43 : vector<1x1x16xf32> to vector<1x16xf32>
    %45 = arith.addf %44, %37 : vector<1x16xf32>
    %c2_34 = arith.constant 2 : index
    %c0_35 = arith.constant 0 : index
    %c0_36 = arith.constant 0 : index
    %46 = vector.load %arg5[%c2_34, %c0_35, %c0_36] : memref<4x1x16xf32, #tpu.memory_space<vmem>>, vector<1x1x16xf32>
    %47 = vector.shape_cast %46 : vector<1x1x16xf32> to vector<1x16xf32>
    %48 = vector.shape_cast %45 : vector<1x16xf32> to vector<1x1x16xf32>
    tpu.vector_store %arg5[%c2_34, %c0_35, %c0_36], %48 {strides = array<i32>} : memref<4x1x16xf32, #tpu.memory_space<vmem>>, vector<1x1x16xf32>,
    %c3 = arith.constant 3 : index
    %c0_37 = arith.constant 0 : index
    %c0_38 = arith.constant 0 : index
    %49 = vector.load %arg5[%c3, %c0_37, %c0_38] : memref<4x1x16xf32, #tpu.memory_space<vmem>>, vector<1x1x16xf32>
    %50 = vector.shape_cast %49 : vector<1x1x16xf32> to vector<1x16xf32>
    %51 = arith.addf %50, %42 : vector<1x16xf32>
    %c3_39 = arith.constant 3 : index
    %c0_40 = arith.constant 0 : index
    %c0_41 = arith.constant 0 : index
    %52 = vector.load %arg5[%c3_39, %c0_40, %c0_41] : memref<4x1x16xf32, #tpu.memory_space<vmem>>, vector<1x1x16xf32>
    %53 = vector.shape_cast %52 : vector<1x1x16xf32> to vector<1x16xf32>
    %54 = vector.shape_cast %51 : vector<1x16xf32> to vector<1x1x16xf32>
    tpu.vector_store %arg5[%c3_39, %c0_40, %c0_41], %54 {strides = array<i32>} : memref<4x1x16xf32, #tpu.memory_space<vmem>>, vector<1x1x16xf32>,
    %c0_i32_42 = arith.constant 0 : i32
    %55 = arith.cmpi eq, %arg1, %c0_i32_42 : i32
    %56 = arith.extui %55 : i1 to i32
    %c0_i32_43 = arith.constant 0 : i32
    %57 = arith.cmpi ne, %56, %c0_i32_43 : i32
    scf.if %57 {
      %cst_44 = arith.constant 0.000000e+00 : f32
      %58 = vector.broadcast %cst_44 : f32 to vector<1x1xf32>
      %c0_45 = arith.constant 0 : index
      %c0_46 = arith.constant 0 : index
      %c0_47 = arith.constant 0 : index
      %59 = vector.load %arg5[%c0_45, %c0_46, %c0_47] : memref<4x1x16xf32, #tpu.memory_space<vmem>>, vector<1x1x16xf32>
      %60 = vector.shape_cast %59 : vector<1x1x16xf32> to vector<1x16xf32>
      %61 = vector.shape_cast %60 : vector<1x16xf32> to vector<1x1x16xf32>
      %cst_48 = arith.constant dense<0.000000e+00> : vector<1xf32>
      %62 = vector.multi_reduction <add>, %61, %cst_48 [1, 2] : vector<1x1x16xf32> to vector<1xf32>
      %63 = vector.shape_cast %62 : vector<1xf32> to vector<1x1x1xf32>
      %64 = vector.extract %63[0, 0, 0] : f32 from vector<1x1x1xf32>
      %65 = vector.broadcast %64 : f32 to vector<1x1xf32>
      %c1_49 = arith.constant 1 : index
      %c0_50 = arith.constant 0 : index
      %c0_51 = arith.constant 0 : index
      %66 = vector.load %arg5[%c1_49, %c0_50, %c0_51] : memref<4x1x16xf32, #tpu.memory_space<vmem>>, vector<1x1x16xf32>
      %67 = vector.shape_cast %66 : vector<1x1x16xf32> to vector<1x16xf32>
      %68 = vector.shape_cast %67 : vector<1x16xf32> to vector<1x1x16xf32>
      %cst_52 = arith.constant dense<0.000000e+00> : vector<1xf32>
      %69 = vector.multi_reduction <add>, %68, %cst_52 [1, 2] : vector<1x1x16xf32> to vector<1xf32>
      %70 = vector.shape_cast %69 : vector<1xf32> to vector<1x1x1xf32>
      %71 = vector.extract %70[0, 0, 0] : f32 from vector<1x1x1xf32>
      %72 = vector.broadcast %71 : f32 to vector<1x1xf32>
      %cst_53 = arith.constant 2.000000e+00 : f32
      %73 = vector.broadcast %cst_53 : f32 to vector<1x1xf32>
      %74 = arith.mulf %73, %65 : vector<1x1xf32>
      %cst_54 = arith.constant 1.000000e-10 : f32
      %75 = vector.broadcast %cst_54 : f32 to vector<1x1xf32>
      %76 = arith.addf %74, %75 : vector<1x1xf32>
      %cst_55 = arith.constant 1.000000e-10 : f32
      %77 = vector.broadcast %cst_55 : f32 to vector<1x1xf32>
      %78 = arith.addf %72, %77 : vector<1x1xf32>
      %79 = arith.divf %76, %78 : vector<1x1xf32>
      %cst_56 = arith.constant 0.333333343 : f32
      %80 = vector.broadcast %cst_56 : f32 to vector<1x1xf32>
      %81 = arith.mulf %79, %80 : vector<1x1xf32>
      %82 = arith.addf %58, %81 : vector<1x1xf32>
      %c2_57 = arith.constant 2 : index
      %c0_58 = arith.constant 0 : index
      %c0_59 = arith.constant 0 : index
      %83 = vector.load %arg5[%c2_57, %c0_58, %c0_59] : memref<4x1x16xf32, #tpu.memory_space<vmem>>, vector<1x1x16xf32>
      %84 = vector.shape_cast %83 : vector<1x1x16xf32> to vector<1x16xf32>
      %85 = vector.shape_cast %84 : vector<1x16xf32> to vector<1x1x16xf32>
      %cst_60 = arith.constant dense<0.000000e+00> : vector<1xf32>
      %86 = vector.multi_reduction <add>, %85, %cst_60 [1, 2] : vector<1x1x16xf32> to vector<1xf32>
      %87 = vector.shape_cast %86 : vector<1xf32> to vector<1x1x1xf32>
      %88 = vector.extract %87[0, 0, 0] : f32 from vector<1x1x1xf32>
      %89 = vector.broadcast %88 : f32 to vector<1x1xf32>
      %c3_61 = arith.constant 3 : index
      %c0_62 = arith.constant 0 : index
      %c0_63 = arith.constant 0 : index
      %90 = vector.load %arg5[%c3_61, %c0_62, %c0_63] : memref<4x1x16xf32, #tpu.memory_space<vmem>>, vector<1x1x16xf32>
      %91 = vector.shape_cast %90 : vector<1x1x16xf32> to vector<1x16xf32>
      %92 = vector.shape_cast %91 : vector<1x16xf32> to vector<1x1x16xf32>
      %cst_64 = arith.constant dense<0.000000e+00> : vector<1xf32>
      %93 = vector.multi_reduction <add>, %92, %cst_64 [1, 2] : vector<1x1x16xf32> to vector<1xf32>
      %94 = vector.shape_cast %93 : vector<1xf32> to vector<1x1x1xf32>
      %95 = vector.extract %94[0, 0, 0] : f32 from vector<1x1x1xf32>
      %96 = vector.broadcast %95 : f32 to vector<1x1xf32>
      %cst_65 = arith.constant 2.000000e+00 : f32
      %97 = vector.broadcast %cst_65 : f32 to vector<1x1xf32>
      %98 = arith.mulf %97, %89 : vector<1x1xf32>
      %cst_66 = arith.constant 1.000000e-10 : f32
      %99 = vector.broadcast %cst_66 : f32 to vector<1x1xf32>
      %100 = arith.addf %98, %99 : vector<1x1xf32>
      %cst_67 = arith.constant 1.000000e-10 : f32
      %101 = vector.broadcast %cst_67 : f32 to vector<1x1xf32>
      %102 = arith.addf %96, %101 : vector<1x1xf32>
      %103 = arith.divf %100, %102 : vector<1x1xf32>
      %cst_68 = arith.constant 0.666666686 : f32
      %104 = vector.broadcast %cst_68 : f32 to vector<1x1xf32>
      %105 = arith.mulf %103, %104 : vector<1x1xf32>
      %106 = arith.addf %82, %105 : vector<1x1xf32>
      %c0_69 = arith.constant 0 : index
      %c0_70 = arith.constant 0 : index
      %c0_71 = arith.constant 0 : index
      %107 = vector.load %arg4[%c0_69, %c0_70, %c0_71] : memref<1x1x1xf32, #tpu.memory_space<vmem>>, vector<1x1x1xf32>
      %108 = vector.shape_cast %107 : vector<1x1x1xf32> to vector<1x1xf32>
      %109 = vector.shape_cast %106 : vector<1x1xf32> to vector<1x1x1xf32>
      tpu.vector_store %arg4[%c0_69, %c0_70, %c0_71], %109 {strides = array<i32>} : memref<1x1x1xf32, #tpu.memory_space<vmem>>, vector<1x1x1xf32>,
    } else {
    }
    return
  }
  func.func @transform_0(%arg0: i32, %arg1: i32) -> (i32, i32, i32, i32) {
    %c0_i32 = arith.constant 0 : i32
    %c0_i32_0 = arith.constant 0 : i32
    %c0_i32_1 = arith.constant 0 : i32
    return %arg0, %c0_i32, %arg1, %c0_i32_0 : i32, i32, i32, i32
  }
  func.func @transform_1(%arg0: i32, %arg1: i32) -> (i32, i32, i32, i32) {
    %c0_i32 = arith.constant 0 : i32
    %c0_i32_0 = arith.constant 0 : i32
    %c0_i32_1 = arith.constant 0 : i32
    return %arg0, %c0_i32, %c0_i32_0, %arg1 : i32, i32, i32, i32
  }
  func.func @transform_2(%arg0: i32, %arg1: i32) -> (i32, i32, i32) {
    %c0_i32 = arith.constant 0 : i32
    %c0_i32_0 = arith.constant 0 : i32
    %c0_i32_1 = arith.constant 0 : i32
    return %arg0, %c0_i32, %c0_i32_0 : i32, i32, i32
  }
}

</mosaic_0001>

<bundles_post_ra>
// kernel: tpu_custom_call.1
= control target key start
LH: loop header
LB: loop body
LE: loop exit
PB: predicated region body
PF: predicated region fallthrough
CT: control target
= control target key end

     0   :  { %7 = vsyncpa [#allocation4], 0  ;;  %s1001_s0 = inlined_call_operand.hbm [shape: f32[2,2,16,16], index: 0, kind: input, shape index: {}]   ;;  %s1002_s1 = inlined_call_operand.hbm [shape: bf16[2,2,16,16], index: 1, kind: input, shape index: {}]   ;;  %s1003_s2 = inlined_call_operand.vmem [shape: f32[2,1,1], index: 2, kind: output, shape index: {}]  }
   0x1   :  { %9 = vsyncpa [#allocation4 + $0x1], 0 }
   0x2   :  { %10 = vsyncpa [#allocation6], 0 }
   0x3   :  { %12 = vsyncpa [#allocation6 + $0x1], 0  ;;  %s805_s9 = smov 0   ;;  %s807_s10 = smov 0  }
   0x4   :  { %s809_s11 = smov 0   ;;  %s811_s12 = smov 0  }
   0x5   :  { %s813_s13 = smov 0   ;;  %s815_s14 = smov 0  }
   0x6 LB: > { %s546_s15 = sadd.s32 4294967295, %s781_s14   ;;  %s30_s16 = sadd.s32 1, %s777_s13  ;;  %s781_s14 = sphi %s815_s14, %s18_s14   ;;  %s777_s13 = sphi %s813_s13, %s1014_s13   ;;  %s773_s12 = sphi %s811_s12, %s1013_s12   ;;  %s769_s11 = sphi %s809_s11, %s1012_s11   ;;  %s765_s10 = sphi %s807_s10, %s1011_s10   ;;  %s761_s9 = sphi %s805_s9, %s1010_s9  }
   0x7   : > { %p32_p0 = scmp.ge.s32.totalorder %s30_s16, 2  ;;  %s39_s17 = sadd.s32 1, %s769_s11 }
   0x8   : > { %p46_p1 = scmp.ne.s32.totalorder %s769_s11, %s765_s10  ;;  %p47_p2 = scmp.eq.s32.totalorder %s781_s14, 0 }
   0x9   : > { %s1016_s16 = smov (%p32_p0, %s30_s16), 0  ;;  %p52_p4 = scmp.ne.s32.totalorder %s765_s10, %s761_s9 }
   0xa   : > { %p841_p3 = por %p47_p2, %p46_p1  ;;  %s34_s19 = ssub.s32 %s777_s13, %s1016_s16 }
   0xb   : > { %p53_p5 = scmp.eq.s32.totalorder %s546_s15, 0  ;;  %p37_p6 = scmp.eq.s32.totalorder %s34_s19, 0 }
   0xc   : > { %p595_p8 = scmp.lt.s32.totalorder %s781_s14, 2  ;;  %s857_s22 = sand.u32 1, %s769_s11  }
   0xd   : > { %p848_p7 = por %p53_p5, %p52_p4  ;;  %s565_s23 = sshll.u32 %s777_s13, 9 }
   0xe   : > { %s854_s21 = scalar_select %p37_p6, %s769_s11, %s39_s17  }
   0xf   : > { %s1006_s20 = scalar_select %p848_p7, 1, 0 }
  0x10   : > { %s550_s24 = sshll.u32 %s857_s22, 5  ;;  %s864_s27 = scalar_lea.hbm %s1001_s0, %s565_s23 }
  0x11   : > { %s134_s28 = scalar_lea.vmem [#allocation3], %s550_s24  ;;  %p868_p9 = pnand %p595_p8, %p841_p3 }
  0x12   : > { %s143_s29 = sshll.u32 %s134_s28, 4  ;;  %s131_s3 = scalar_lea.sflag [#allocation4], %s857_s22  ;;  %s872_s29 = int_to_ptr.vmem [resolvable:$true] %s143_s29 }
  0x13   : > { %s667_s4 = scalar_lea.hbm %s864_s27, 512  ;;  %p669_p11 = pneg %p868_p9 }
  0x14   : > { %p668_p10 = scmp.ne.s32.totalorder %s864_s27, %s667_s4  ;;  %s672_s7 = scalar_lea.hbm %s1001_s0, 1024 }
  0x15   : > { %p673_p0 = scmp.lt.u32.totalorder %s864_s27, %s1001_s0  ;;  %p674_p1 = scmp.lt.u32.totalorder %s672_s7, %s667_s4 }
  0x16   : > { %p670_p12 = pnand %p669_p11, %p668_p10  ;;  %p676_p3 = scmp.lt.u32.totalorder %s667_s4, %s864_s27 }
  0x17   : > { %p675_p2 = por %p674_p1, %p673_p0 }
  0x18   : > { %p671_p13 = pneg %p670_p12 }
  0x19   : > { %p677_p4 = por %p676_p3, %p675_p2 }
  0x1b   : > { %p678_p5 = pnand %p677_p4, %p671_p13 }
  0x1d   : > { %681 = shalt.err (!%p678_p5)
}
  0x1e   : > { %s682_s15 = scalar_lea.vmem %s872_s29, 512  ;;  %s783_s17 = smov [#allocation3]  }
  0x1f   : > { %p683_p6 = scmp.ne.s32.totalorder %s872_s29, %s682_s15  ;;  %s687_s18 = sshll.u32 %s783_s17, 4  ;;  %s688_s18 = int_to_ptr.vmem [resolvable:$false] %s687_s18 }
  0x20   : > { %s689_s19 = scalar_lea.vmem %s688_s18, 1024  ;;  %p690_p12 = scmp.lt.s32.totalorder %s872_s29, %s688_s18 }
  0x21   : > { %p685_p8 = pnand %p683_p6, %p669_p11  ;;  %p691_p0 = scmp.lt.s32.totalorder %s689_s19, %s682_s15 }
  0x23   : > { %p686_p10 = pneg %p685_p8  ;;  %p692_p1 = por %p691_p0, %p690_p12 }
  0x25   : > { %p693_p2 = pnand %p692_p1, %p686_p10 }
  0x27   : > { %696 = shalt.err (!%p693_p2)
}
  0x28   : > { %s784_s23 = smov 128   ;;  %s785_s24 = smov 8  }
  0x29   : > { %591 = dma.hbm_to_vmem [thread:$0]  (!%p868_p9), %s864_s27, 512, %s872_s29, %s131_s3, %s784_s23, %s784_s23, %s785_s24  }
  0x2a   : > { %p556_p13 = scmp.ge.s32.totalorder %s781_s14, 1  ;;  %p173_p3 = scmp.lt.s32.totalorder %s781_s14, 3 }
  0x2b   : > { %s553_s25 = sshll.u32 %s857_s22, 4  ;;  %s566_s28 = sshll.u32 %s777_s13, 8 }
  0x2c   : > { %p905_p4 = pnand %p556_p13, %p173_p3  ;;  %s157_s4 = scalar_lea.vmem [#allocation5], %s553_s25 }
  0x2d   : > { %s165_s5 = sshll.u32 %s157_s4, 4  ;;  %s913_s8 = scalar_lea.hbm %s1002_s1, %s566_s28  ;;  %s915_s5 = int_to_ptr.vmem [resolvable:$true] %s165_s5 }
  0x2e   : > { %s154_s27 = scalar_lea.sflag [#allocation6], %s857_s22  ;;  %s697_s29 = scalar_lea.hbm %s913_s8, 256 }
  0x2f   : > { %p698_p5 = scmp.ne.s32.totalorder %s913_s8, %s697_s29  ;;  %s702_s15 = scalar_lea.hbm %s1002_s1, 512 }
  0x30   : > { %p703_p10 = scmp.lt.u32.totalorder %s913_s8, %s1002_s1  ;;  %p704_p12 = scmp.lt.u32.totalorder %s702_s15, %s697_s29 }
  0x31   : > { %p700_p6 = pnand %p698_p5, %p669_p11  ;;  %p706_p1 = scmp.lt.u32.totalorder %s697_s29, %s913_s8 }
  0x32   : > { %p705_p0 = por %p704_p12, %p703_p10 }
  0x33   : > { %p701_p8 = pneg %p700_p6 }
  0x34   : > { %p707_p2 = por %p706_p1, %p705_p0 }
  0x36   : > { %p708_p13 = pnand %p707_p2, %p701_p8 }
  0x38   : > { %711 = shalt.err (!%p708_p13)
}
  0x39   : > { %s712_s19 = scalar_lea.vmem %s915_s5, 256  ;;  %s786_s23 = smov [#allocation5]  }
  0x3a   : > { %p713_p3 = scmp.ne.s32.totalorder %s915_s5, %s712_s19  ;;  %s717_s24 = sshll.u32 %s786_s23, 4  ;;  %s718_s24 = int_to_ptr.vmem [resolvable:$false] %s717_s24 }
  0x3b   : > { %s719_s25 = scalar_lea.vmem %s718_s24, 512  ;;  %p720_p7 = scmp.lt.s32.totalorder %s915_s5, %s718_s24 }
  0x3c   : > { %p715_p5 = pnand %p713_p3, %p669_p11  ;;  %p721_p10 = scmp.lt.s32.totalorder %s719_s25, %s712_s19 }
  0x3e   : > { %p716_p6 = pneg %p715_p5  ;;  %p722_p12 = por %p721_p10, %p720_p7 }
  0x40   : > { %p723_p0 = pnand %p722_p12, %p716_p6 }
  0x42   : > { %726 = shalt.err (!%p723_p0)
}
  0x43   : > { %s787_s28 = smov 64   ;;  %s788_s4 = smov 4  }
  0x44   : > { %594 = dma.hbm_to_vmem [thread:$0]  (!%p868_p9), %s913_s8, 256, %s915_s5, %s154_s27, %s787_s28, %s787_s28, %s788_s4  }
  0x45   : > { %177 = sbr.rel (%p905_p4) target bundleno = 482 (0x1e2), region = 28  ;;  %s179_s6 = sand.u32 (!%p905_p4), 1, %s765_s10  }
  0x46   : > { %s557_s7 = sshll.u32 (!%p905_p4), %s179_s6, 5  ;;  %s180_s29 = scalar_lea.sflag (!%p905_p4), [#allocation4], %s179_s6 }
  0x47   : > { %s183_s3 = scalar_lea.vmem (!%p905_p4), [#allocation3], %s557_s7  ;;  %p1009_p7 = scmp.ne.s32.totalorder (!%p905_p4), %s1006_s20, 0 }
  0x4c   : > { %752 = dma.done.wait (%p1009_p7), %s180_s29, 512  }
  0x4d   : > { %754 = vsyncadd (%p1009_p7), %s180_s29, 4294966784  ;;  %s558_s9 = sshll.u32 %s179_s6, 4  ;;  %s189_s15 = scalar_lea.sflag [#allocation6], %s179_s6 }
  0x4e   : > { %s192_s30 = scalar_lea.vmem [#allocation5], %s558_s9 }
  0x4f   : > { %756 = dma.done.wait (%p1009_p7), %s189_s15, 256  }
  0x50   : > { %758 = vsyncadd (%p1009_p7), %s189_s15, 4294967040  ;;  %v568_v0 = vld [vmem:[%s192_s30] sm:$0xff]   ;;  %v575_v1 = vld [vmem:[%s192_s30 + $0x8] sm:$0xff]   ;;  %vm224_vm0 = vcmask 122880   ;;  %v789_v8 = vmov 0.0   ;;  %vm269_vm1 = vcmask 130048  }
  0x51   : > { %v569_v2 = vunpack.c.l.bf16 %v568_v0  ;;  %v573_v3 = vunpack.c.l.bf16 %v575_v1  ;;  %v570_v4 = vunpack.c.h.bf16 %v568_v0  ;;  %v574_v5 = vunpack.c.h.bf16 %v575_v1  ;;  %225 = vst.msk [vmem:[#allocation2] sm:$0x1] %vm224_vm0, %v789_v8  ;;  %226 = vst.msk [vmem:[#allocation2 + $0x1] sm:$0x1] %vm224_vm0, %v789_v8  ;;  %v560_v9 = vld [vmem:[%s183_s3 + $0x18] sm:$0xff]  ;;  %v559_v10 = vld [vmem:[%s183_s3 + $0x10] sm:$0xff] }
  0x52   : > { %227 = vst.msk [vmem:[#allocation2 + $0x2] sm:$0x1] %vm224_vm0, %v789_v8  ;;  %228 = vst.msk [vmem:[#allocation2 + $0x3] sm:$0x1] %vm224_vm0, %v789_v8  ;;  %v230_v11 = vld [vmem:[%s183_s3 + $0x8] sm:$0xff]  ;;  %v357_v12 = vsel %vm269_vm1, %v559_v10, 0.0 }
  0x53   : > { %v649_v6 = vpack.i.bf16 %v573_v3, %v569_v2  ;;  %v651_v7 = vpack.i.bf16 %v574_v5, %v570_v4  ;;  %v358_v13 = vsel %vm269_vm1, %v560_v9, 0.0  ;;  %v229_v14 = vld [vmem:[%s183_s3] sm:$0xff]  ;;  %v280_v16 = vsel %vm269_vm1, %v230_v11, 0.0  ;;  %p217_p9 = scmp.lt.s32.totalorder %s773_s12, 1 }
  0x54   : > { %v279_v15 = vsel %vm269_vm1, %v229_v14, 0.0  ;;  %v359_v17 = vadd.f32 %v358_v13, %v357_v12  ;;  %vm449_vm2 = vcmask 0  }
  0x55   : > { %650 = vxpose.xlu0.b32.start [1/2] (short) (narrow) %v649_v6, 16  ;;  %v281_v18 = vadd.f32 %v280_v16, %v279_v15  ;;  %s1018_s12 = smov (!%p217_p9, %s773_s12), 1 }
  0x56   : > { %v360_v19 = vrot.slane %v359_v17, 4  ;;  %s219_s17 = scalar_lea.vmem %s1003_s2, %s1018_s12 }
  0x57   : > { %v282_v20 = vrot.slane %v281_v18, 4 }
  0x58   : > { %v361_v23 = vadd.f32 %v360_v19, %v359_v17  ;;  %v298_v13 = vld [vmem:[#allocation2] sm:$0x1] }
  0x59   : > { %652 = vxpose.xlu0.b32.end [2/2] (short) (narrow) %v651_v7, 16  ;;  %v283_v25 = vadd.f32 %v282_v20, %v281_v18  ;;  %v381_v12 = vld [vmem:[#allocation2 + $0x3] sm:$0x1] }
  0x5a   : > { %v362_v28 = vrot.slane %v361_v23, 2 }
  0x5b   : > { %v284_v35 = vrot.slane %v283_v25, 2 }
  0x5c   : > { %v363_v41 = vadd.f32 %v362_v28, %v361_v23 }
  0x5d   : > { %v285_v49 = vadd.f32 %v284_v35, %v283_v25 }
  0x5e   : > { %v364_v55 = vrot.slane %v363_v41, 1 }
  0x5f   : > { %v286_v59 = vrot.slane %v285_v49, 1 }
  0x60   : > { %v365_v1 = vadd.f32 %v364_v55, %v363_v41 }
  0x61   : > { %v287_v5 = vadd.f32 %v286_v59, %v285_v49 }
  0xd5   : > { %v653_v21 = vpop.trf.xlu0 }
  0xd6   : > { %v657_v22 = vunpack.i.h.bf16 %v653_v21  ;;  %v654_v24 = vunpack.i.l.bf16 %v653_v21 }
  0xd8   : > { %v346_v27 = vmul.f32 %v657_v22, %v559_v10  ;;  %v267_v30 = vmul.f32 %v654_v24, %v229_v14  ;;  %v366_v32 = vsel %vm269_vm1, %v657_v22, 0.0  ;;  %v288_v36 = vsel %vm269_vm1, %v654_v24, 0.0  ;;  %v303_v14 = vld [vmem:[#allocation2 + $0x1] sm:$0x1] }
  0xd9   : > { %v658_v26 = vpop.trf.xlu0 }
  0xda   : > { %v662_v29 = vunpack.i.h.bf16 %v658_v26  ;;  %v659_v31 = vunpack.i.l.bf16 %v658_v26  ;;  %v348_v40 = vsel %vm269_vm1, %v346_v27, 0.0  ;;  %v270_v44 = vsel %vm269_vm1, %v267_v30, 0.0 }
  0xdc   : > { %v347_v33 = vmul.f32 %v662_v29, %v560_v9  ;;  %v367_v34 = vsel %vm269_vm1, %v662_v29, 0.0  ;;  %v268_v37 = vmul.f32 %v659_v31, %v230_v11  ;;  %v289_v38 = vsel %vm269_vm1, %v659_v31, 0.0  ;;  %v377_v11 = vld [vmem:[#allocation2 + $0x2] sm:$0x1] }
  0xdd   : > { %v368_v39 = vadd.f32 %v367_v34, %v366_v32  ;;  %v290_v43 = vadd.f32 %v289_v38, %v288_v36 }
  0xde   : > { %v349_v42 = vsel %vm269_vm1, %v347_v33, 0.0  ;;  %v271_v45 = vsel %vm269_vm1, %v268_v37, 0.0 }
  0xdf   : > { %v350_v46 = vadd.f32 %v349_v42, %v348_v40  ;;  %v369_v47 = vrot.slane %v368_v39, 4  ;;  %v272_v48 = vadd.f32 %v271_v45, %v270_v44  ;;  %v291_v50 = vrot.slane %v290_v43, 4 }
  0xe1   : > { %v351_v51 = vrot.slane %v350_v46, 4  ;;  %v370_v52 = vadd.f32 %v369_v47, %v368_v39  ;;  %v273_v53 = vrot.slane %v272_v48, 4  ;;  %v292_v54 = vadd.f32 %v291_v50, %v290_v43 }
  0xe3   : > { %v352_v56 = vadd.f32 %v351_v51, %v350_v46  ;;  %v371_v57 = vrot.slane %v370_v52, 2  ;;  %v274_v58 = vadd.f32 %v273_v53, %v272_v48  ;;  %v293_v60 = vrot.slane %v292_v54, 2 }
  0xe5   : > { %v353_v61 = vrot.slane %v352_v56, 2  ;;  %v372_v62 = vadd.f32 %v371_v57, %v370_v52  ;;  %v275_v63 = vrot.slane %v274_v58, 2  ;;  %v294_v0 = vadd.f32 %v293_v60, %v292_v54 }
  0xe7   : > { %v354_v2 = vadd.f32 %v353_v61, %v352_v56  ;;  %v373_v3 = vrot.slane %v372_v62, 1  ;;  %v276_v4 = vadd.f32 %v275_v63, %v274_v58  ;;  %v295_v6 = vrot.slane %v294_v0, 1 }
  0xe9   : > { %v355_v7 = vrot.slane %v354_v2, 1  ;;  %v374_v8 = vadd.f32 %v373_v3, %v372_v62  ;;  %v277_v9 = vrot.slane %v276_v4, 1  ;;  %v296_v10 = vadd.f32 %v295_v6, %v294_v0 }
  0xeb   : > { %v356_v15 = vadd.f32 %v355_v7, %v354_v2  ;;  %v375_v16 = vadd.f32 %v374_v8, %v365_v1  ;;  %v278_v17 = vadd.f32 %v277_v9, %v276_v4  ;;  %v297_v18 = vadd.f32 %v296_v10, %v287_v5 }
  0xed   : > { %v378_v19 = vadd.f32 %v377_v11, %v356_v15  ;;  %v382_v20 = vadd.f32 %v381_v12, %v375_v16  ;;  %v299_v21 = vadd.f32 %v298_v13, %v278_v17  ;;  %v304_v22 = vadd.f32 %v303_v14, %v297_v18 }
  0xef   : > { %379 = vst.msk [vmem:[#allocation2 + $0x2] sm:$0x1] %vm224_vm0, %v378_v19  ;;  %383 = vst.msk [vmem:[#allocation2 + $0x3] sm:$0x1] %vm224_vm0, %v382_v20 }
  0xf0   : > { %301 = vst.msk [vmem:[#allocation2] sm:$0x1] %vm224_vm0, %v299_v21  ;;  %305 = vst.msk [vmem:[#allocation2 + $0x1] sm:$0x1] %vm224_vm0, %v304_v22 }
  0xf6   : > { %v418_v23 = vld [vmem:[#allocation2 + $0x2] sm:$0x1]  ;;  %v430_v29 = vld [vmem:[#allocation2 + $0x3] sm:$0x1] }
  0xf7   : > { %v419_v24 = vsel %vm224_vm0, %v418_v23, 0.0  ;;  %v387_v25 = vld [vmem:[#allocation2] sm:$0x1]  ;;  %v399_v27 = vld [vmem:[#allocation2 + $0x1] sm:$0x1]  ;;  %v431_v30 = vsel %vm224_vm0, %v430_v29, 0.0 }
  0xf8   : > { %420 = vadd.xlane.f32.xlu0 %v419_v24  ;;  %v388_v26 = vsel %vm224_vm0, %v387_v25, 0.0  ;;  %v400_v28 = vsel %vm224_vm0, %v399_v27, 0.0 }
  0xf9   : > { %389 = vadd.xlane.f32.xlu1 %v388_v26 }
  0xfd   : > { %401 = vadd.xlane.f32.xlu1 %v400_v28 }
 0x101   : > { %432 = vadd.xlane.f32.xlu1 %v431_v30 }
 0x185   : > { %v421_v31 = vpop.xlane.xlu0 %420 }
 0x186   : > { %v422_v32 = vrot.slane %v421_v31, 4  ;;  %v390_v33 = vpop.xlane.xlu1 %389 }
 0x187   : > { %v391_v34 = vrot.slane %v390_v33, 4 }
 0x188   : > { %v423_v35 = vadd.f32 %v422_v32, %v421_v31 }
 0x189   : > { %v392_v36 = vadd.f32 %v391_v34, %v390_v33 }
 0x18a   : > { %v424_v37 = vrot.slane %v423_v35, 2  ;;  %v402_v38 = vpop.xlane.xlu1 %401 }
 0x18b   : > { %v393_v39 = vrot.slane %v392_v36, 2  ;;  %v403_v40 = vrot.slane %v402_v38, 4 }
 0x18c   : > { %v425_v43 = vadd.f32 %v424_v37, %v423_v35 }
 0x18d   : > { %v404_v41 = vadd.f32 %v403_v40, %v402_v38  ;;  %v394_v42 = vadd.f32 %v393_v39, %v392_v36 }
 0x18e   : > { %v433_v44 = vpop.xlane.xlu1 %432  ;;  %v426_v51 = vrot.slane %v425_v43, 1 }
 0x18f   : > { %v405_v45 = vrot.slane %v404_v41, 2  ;;  %v434_v46 = vrot.slane %v433_v44, 4  ;;  %v395_v47 = vrot.slane %v394_v42, 1 }
 0x190   : > { %v427_v56 = vadd.f32 %v426_v51, %v425_v43 }
 0x191   : > { %v435_v48 = vadd.f32 %v434_v46, %v433_v44  ;;  %v396_v49 = vadd.f32 %v395_v47, %v394_v42  ;;  %v406_v50 = vadd.f32 %v405_v45, %v404_v41 }
 0x193   : > { %v436_v52 = vrot.slane %v435_v48, 2  ;;  %576 = vpush %v396_v49  ;;  %v407_v53 = vrot.slane %v406_v50, 1 }
 0x195   : > { %v437_v54 = vadd.f32 %v436_v52, %v435_v48  ;;  %v408_v55 = vadd.f32 %v407_v53, %v406_v50 }
 0x197   : > { %578 = vpush %v408_v55  ;;  %v438_v57 = vrot.slane %v437_v54, 1 }
 0x198   : > { %580 = vpush %v427_v56 }
 0x199   : > { %v439_v58 = vadd.f32 %v438_v57, %v437_v54 }
 0x19b   : > { %582 = vpush %v439_v58 }
 0x1c4   : > { %s577_s20 = spop %576 }
 0x1c5   : > { %v398_v63 = vstv %s577_s20 }
 0x1c6   : > { %v411_v1 = vmul.f32 2.0, %v398_v63 }
 0x1c8   : > { %s579_s22 = spop %578  ;;  %v412_v4 = vadd.f32 1e-10, %v411_v1 }
 0x1c9   : > { %v410_v59 = vstv %s579_s22  ;;  %s581_s26 = spop %580 }
 0x1ca   : > { %v413_v60 = vadd.f32 1e-10, %v410_v59  ;;  %v429_v0 = vstv %s581_s26 }
 0x1cb   : > { %v442_v2 = vmul.f32 2.0, %v429_v0 }
 0x1cc   : > { %663 = vrcp.f32 %v413_v60  ;;  %s583_s5 = spop %582 }
 0x1cd   : > { %v441_v61 = vstv %s583_s5  ;;  %v443_v6 = vadd.f32 1e-10, %v442_v2 }
 0x1ce   : > { %v444_v62 = vadd.f32 1e-10, %v441_v61 }
 0x1d0   : > { %665 = vrcp.f32 %v444_v62 }
 0x1d6   : > { %v664_v3 = vpop.eup %663 }
 0x1d7   : > { %v415_v5 = vmul.f32 %v664_v3, %v412_v4 }
 0x1d9   : > { %v416_v9 = vmul.f32 0.33333334, %v415_v5 }
 0x1da   : > { %v666_v7 = vpop.eup %665 }
 0x1db   : > { %v446_v8 = vmul.f32 %v666_v7, %v443_v6 }
 0x1dd   : > { %v447_v10 = vmul.f32 0.6666667, %v446_v8 }
 0x1df   : > { %v448_v11 = vadd.f32 %v447_v10, %v416_v9 }
 0x1e1   : > { %450 = vst.msk [vmem:[%s219_s17] sm:$0x1] %vm449_vm2, %v448_v11 }
 0x1e2 PF: > { %s18_s14 = sadd.s32 1, %s781_s14   ;;  %s1010_s9 = smov %s765_s10 }
 0x1e3   : > { %p15_p11 = scmp.ge.s32.totalorder %s18_s14, 4   ;;  %s1011_s10 = smov %s769_s11 }
 0x1e4   : > { %s1012_s11 = smov %s854_s21  ;;  %s1013_s12 = smov %s777_s13 }
 0x1e5   : > { %s1014_s13 = smov %s1016_s16  ;;  %17 = sbr.rel (!%p15_p11) target bundleno = 6 (0x6), region = 94 }
 0x1ec   :  { %468 = vsyncpa [#allocation4], 1 }
 0x1ed   :  { %470 = vsyncpa [#allocation4 + $0x1], 1 }
 0x1ee   :  { %471 = vsyncpa [#allocation6], 1 }
 0x1ef   :  { %473 = vsyncpa [#allocation6 + $0x1], 1 }

</bundles_post_ra>
